<compile_context>
chip_gen: v7x
topology: tpu7x:2x2x1
jax: 0.10.0
libtpu: 0.0.40
codegen_flags: <defaults>
</compile_context>

<pallas_src>
import jax
import jax.numpy as jnp
from jax.experimental import pallas as pl
from jax.experimental.pallas import tpu as pltpu

NEG_SLOPE = 0.01  # nn.LeakyReLU default
BN_EPS = 1e-5     # nn.BatchNorm1d default


def _lrelu(x):
    return jnp.where(x > 0, x, NEG_SLOPE * x)


def _rup(v, m):
    return -(-v // m) * m


def video_branch(x, params, bt=None):
    """x: (B, C, L) float32. Returns (B, D) float32 (matches torch .squeeze() for B > 1)."""
    B, C, L = x.shape
    C4 = params["fw1"].shape[0]
    D = params["fw2"].shape[0]

    L1 = L - 2           # after conv1 (valid, k=3)
    L2 = L1 // 2         # after maxpool(2)
    L3 = L2 - 2          # after conv2 (valid, k=3)
    assert L3 >= 1, "sequence length too short for this architecture"
    # Tap-reach invariants (keep in sync with the roll-based operand construction):
    # last averaged conv2 output reads pooled columns up to 2*(L3-1)+4, which must be
    # a valid pooled column; pooled pairs must stay on valid conv1 columns.
    assert 2 * (L3 - 1) + 4 <= 2 * (L2 - 1)
    assert 2 * (L2 - 1) + 1 <= L1 - 1

    # ---- batch packing: put bt batches side-by-side in the lane axis ----
    if bt is None:
        bt = max(1, 256 // L)               # target N = bt*L >= 256 (v6e/v7x MXU width)
        while bt > 1 and -(-B // bt) < 2:   # keep >= 2 grid steps (both v7x TCs busy)
            bt //= 2
    G = -(-B // bt)
    B_pad = G * bt
    if B_pad != B:
        x = jnp.concatenate([x, jnp.zeros((B_pad - B, C, L), x.dtype)], axis=0)
    N = bt * L
    xp = (x.reshape(G, bt, C, L).transpose(0, 2, 1, 3)
           .reshape(G, C, N).astype(jnp.float32))            # (G, C, bt*L)

    # ---- fold BN (eval) + conv bias into weights / per-channel shift; stack taps ----
    inv1 = params["g1"] / jnp.sqrt(params["v1"] + BN_EPS)
    inv2 = params["g2"] / jnp.sqrt(params["v2"] + BN_EPS)
    w1f = inv1[:, None, None] * params["w1"]                  # (C, C, 3)
    w2f = inv2[:, None, None] * params["w2"]
    w1s = jnp.concatenate([w1f[:, :, 0], w1f[:, :, 1], w1f[:, :, 2]], axis=1)  # (C, 3C)
    w2s = jnp.concatenate([w2f[:, :, 0], w2f[:, :, 1], w2f[:, :, 2]], axis=1)
    sh1 = params["b1"] * inv1 + params["be1"] - params["m1"] * inv1            # (C,)
    sh2 = params["b2"] * inv2 + params["be2"] - params["m2"] * inv2

    # ---- mean-reduction matrix (N, bt): AdaptiveAvgPool1d(1) over the L3 valid
    #      stride-2 conv2 output columns of each batch segment (drops all columns
    #      contaminated by roll wrap-around / cross-segment taps) ----
    n_idx = jnp.arange(N)[:, None]
    b_idx = jnp.arange(bt)[None, :]
    jloc = n_idx - b_idx * L
    red = jnp.where((jloc >= 0) & (jloc < 2 * L3) & (jloc % 2 == 0),
                    1.0 / L3, 0.0).astype(jnp.float32)

    # ---- pack all constant operands into ONE lane-padded slab (single DMA) ----
    W_lane = _rup(max(3 * C + 1, C + 1, C4 + 1, bt), 128)
    r_w1 = 0
    r_w2 = r_w1 + _rup(C, 8)
    r_f1 = r_w2 + _rup(C, 8)
    r_f2 = r_f1 + _rup(C4, 8)
    r_rd = r_f2 + _rup(D, 8)
    R = r_rd + _rup(N, 8)

    slab = jnp.zeros((R, W_lane), jnp.float32)
    slab = slab.at[r_w1:r_w1 + C, 0:3 * C].set(w1s)
    slab = slab.at[r_w1:r_w1 + C, 3 * C].set(sh1)
    slab = slab.at[r_w2:r_w2 + C, 0:3 * C].set(w2s)
    slab = slab.at[r_w2:r_w2 + C, 3 * C].set(sh2)
    slab = slab.at[r_f1:r_f1 + C4, 0:C].set(params["fw1"].astype(jnp.float32))
    slab = slab.at[r_f1:r_f1 + C4, C].set(params["fb1"].astype(jnp.float32))
    slab = slab.at[r_f2:r_f2 + D, 0:C4].set(params["fw2"].astype(jnp.float32))
    slab = slab.at[r_f2:r_f2 + D, C4].set(params["fb2"].astype(jnp.float32))
    slab = slab.at[r_rd:r_rd + N, 0:bt].set(red)

    def kernel(x_ref, slab_ref, out_ref):
        x_blk = x_ref[0]                                      # (C, N), batches packed in lanes

        # static slices into the constant slab (views, no extra DMA)
        w1 = slab_ref[r_w1:r_w1 + C, 0:3 * C]                 # (C, 3C)
        s1 = slab_ref[r_w1:r_w1 + C, 3 * C:3 * C + 1]         # (C, 1)
        w2 = slab_ref[r_w2:r_w2 + C, 0:3 * C]
        s2 = slab_ref[r_w2:r_w2 + C, 3 * C:3 * C + 1]
        fw1 = slab_ref[r_f1:r_f1 + C4, 0:C]                   # (C4, C)
        fb1 = slab_ref[r_f1:r_f1 + C4, C:C + 1]
        fw2 = slab_ref[r_f2:r_f2 + D, 0:C4]                   # (D, C4)
        fb2 = slab_ref[r_f2:r_f2 + D, C4:C4 + 1]
        rd = slab_ref[r_rd:r_rd + N, 0:bt]                    # (N, bt)

        def rotl(v, k):
            # shift columns left by k (XLU rotate); wrapped / cross-segment columns
            # land only in per-segment tail columns that `rd` never selects.
            return pltpu.roll(v, (-k) % N, 1)

        # ---- Conv1d #1 (BN folded) + LeakyReLU: operand built in-register, one MXU op
        op1 = jnp.concatenate([x_blk, rotl(x_blk, 1), rotl(x_blk, 2)], axis=0)   # (3C, N)
        h = _lrelu(jnp.dot(w1, op1, preferred_element_type=jnp.float32) + s1)    # (C, N)

        # ---- MaxPool1d(2): roll + max; pooled values live at even per-segment columns
        pp = jnp.maximum(h, rotl(h, 1))                                          # (C, N)

        # ---- Conv1d #2 (BN folded) + LeakyReLU at stride 2 on the uncompacted layout
        op2 = jnp.concatenate([pp, rotl(pp, 2), rotl(pp, 4)], axis=0)            # (3C, N)
        g = _lrelu(jnp.dot(w2, op2, preferred_element_type=jnp.float32) + s2)    # (C, N)

        # ---- AdaptiveAvgPool1d(1): average the L3 valid stride-2 columns per segment
        v = jnp.dot(g, rd, preferred_element_type=jnp.float32)                   # (C, bt)

        # ---- FC head (column form, bt batches wide) ----
        u = _lrelu(jnp.dot(fw1, v, preferred_element_type=jnp.float32) + fb1)    # (C4, bt)
        o = _lrelu(jnp.dot(fw2, u, preferred_element_type=jnp.float32) + fb2)    # (D, bt)

        out_ref[0] = o                                        # (1, D, bt) block

    out = pl.pallas_call(
        kernel,
        out_shape=jax.ShapeDtypeStruct((G, D, bt), jnp.float32),
        grid=(G,),
        in_specs=[
            pl.BlockSpec((1, C, N), lambda g: (g, 0, 0)),     # packed activations
            pl.BlockSpec((R, W_lane), lambda g: (0, 0)),      # constant slab (fetched once)
        ],
        out_specs=pl.BlockSpec((1, D, bt), lambda g: (g, 0, 0)),
        compiler_params=pltpu.CompilerParams(dimension_semantics=("parallel",)),
    )(xp, slab)

    # (G, D, bt) -> (B, D)
    out = jnp.transpose(out, (0, 2, 1)).reshape(B_pad, D)[:B]
    return out


# ---------------- pure-JAX reference (mirrors the PyTorch forward, eval-mode BN) ----------------
def _ref_forward(x, p):
    def conv1d(inp, w, b):
        y = jax.lax.conv_general_dilated(
            inp, w, window_strides=(1,), padding="VALID",
            dimension_numbers=("NCH", "OIH", "NCH"))
        return y + b[None, :, None]

    def bn(inp, m, var, gamma, beta):
        return (inp - m[None, :, None]) * (gamma / jnp.sqrt(var + BN_EPS))[None, :, None] \
            + beta[None, :, None]

    def lrelu(z):
        return jnp.where(z > 0, z, NEG_SLOPE * z)

    h = lrelu(bn(conv1d(x, p["w1"], p["b1"]), p["m1"], p["v1"], p["g1"], p["be1"]))
    B_, C_, L1 = h.shape
    L2 = L1 // 2
    h = jnp.max(h[:, :, : 2 * L2].reshape(B_, C_, L2, 2), axis=-1)
    h = lrelu(bn(conv1d(h, p["w2"], p["b2"]), p["m2"], p["v2"], p["g2"], p["be2"]))
    v = jnp.mean(h, axis=-1)                                   # AdaptiveAvgPool1d(1) + squeeze
    v = lrelu(v @ p["fw1"].T + p["fb1"])
    v = lrelu(v @ p["fw2"].T + p["fb2"])
    return v


if __name__ == "__main__":
    B, C, L, D = 16, 32, 16, 16          # input_channels=32, output_dim=16; bt=8 -> 2 grid steps
    C4 = C // 4

    key = jax.random.PRNGKey(0)
    ks = jax.random.split(key, 20)
    nrm = lambda k, s, sc=0.1: sc * jax.random.normal(k, s, jnp.float32)

    x = jax.random.normal(ks[0], (B, C, L), jnp.float32)

    params = dict(
        w1=nrm(ks[1], (C, C, 3)), b1=nrm(ks[2], (C,)),
        g1=1.0 + nrm(ks[3], (C,)), be1=nrm(ks[4], (C,)),
        m1=nrm(ks[5], (C,)), v1=jax.random.uniform(ks[6], (C,), jnp.float32, 0.5, 1.5),
        w2=nrm(ks[7], (C, C, 3)), b2=nrm(ks[8], (C,)),
        g2=1.0 + nrm(ks[9], (C,)), be2=nrm(ks[10], (C,)),
        m2=nrm(ks[11], (C,)), v2=jax.random.uniform(ks[12], (C,), jnp.float32, 0.5, 1.5),
        fw1=nrm(ks[13], (C4, C)), fb1=nrm(ks[14], (C4,)),
        fw2=nrm(ks[15], (D, C4)), fb2=nrm(ks[16], (D,)),
    )

    out = jax.block_until_ready(video_branch(x, params))
    ref = _ref_forward(x, params)

    assert out.shape == (B, D), f"bad output shape {out.shape}"
    assert jnp.allclose(out, ref, atol=2e-4, rtol=2e-4), \
        f"mismatch, max abs err = {jnp.max(jnp.abs(out - ref))}"
    print("KERNEL_OK")
</pallas_src>

<mosaic_0001>
module attributes {stable_mosaic.version = 11 : i64} {
  func.func @kernel(%arg0: i32, %arg1: memref<1x32x128xf32, #tpu.memory_space<vmem>>, %arg2: memref<216x128xf32, #tpu.memory_space<vmem>>, %arg3: memref<1x16x8xf32, #tpu.memory_space<vmem>>) attributes {dimension_semantics = [#tpu.dimension_semantics<parallel>], iteration_bounds = array<i64: 2>, scalar_prefetch = 0 : i64, scratch_operands = 0 : i64, tpu.core_type = #tpu.core_type<tc>, window_params = [{transform_indices = @transform_0, window_bounds = array<i64: 1, 32, 128>}, {pipeline_mode = #tpu.pipeline_mode<synchronous>, transform_indices = @transform_1, window_bounds = array<i64: 216, 128>}, {transform_indices = @transform_2, window_bounds = array<i64: 1, 16, 8>}]} {
    %c0 = arith.constant 0 : index
    %c0_0 = arith.constant 0 : index
    %c0_1 = arith.constant 0 : index
    %0 = vector.load %arg1[%c0, %c0_0, %c0_1] : memref<1x32x128xf32, #tpu.memory_space<vmem>>, vector<1x32x128xf32>
    %1 = vector.shape_cast %0 : vector<1x32x128xf32> to vector<32x128xf32>
    %c0_2 = arith.constant 0 : index
    %c0_3 = arith.constant 0 : index
    %2 = vector.load %arg2[%c0_2, %c0_3] : memref<216x128xf32, #tpu.memory_space<vmem>>, vector<32x96xf32>
    %c0_4 = arith.constant 0 : index
    %c96 = arith.constant 96 : index
    %3 = vector.load %arg2[%c0_4, %c96] : memref<216x128xf32, #tpu.memory_space<vmem>>, vector<32x1xf32>
    %c32 = arith.constant 32 : index
    %c0_5 = arith.constant 0 : index
    %4 = vector.load %arg2[%c32, %c0_5] : memref<216x128xf32, #tpu.memory_space<vmem>>, vector<32x96xf32>
    %c32_6 = arith.constant 32 : index
    %c96_7 = arith.constant 96 : index
    %5 = vector.load %arg2[%c32_6, %c96_7] : memref<216x128xf32, #tpu.memory_space<vmem>>, vector<32x1xf32>
    %c64 = arith.constant 64 : index
    %c0_8 = arith.constant 0 : index
    %6 = vector.load %arg2[%c64, %c0_8] : memref<216x128xf32, #tpu.memory_space<vmem>>, vector<8x32xf32>
    %c64_9 = arith.constant 64 : index
    %c32_10 = arith.constant 32 : index
    %7 = vector.load %arg2[%c64_9, %c32_10] : memref<216x128xf32, #tpu.memory_space<vmem>>, vector<8x1xf32>
    %c72 = arith.constant 72 : index
    %c0_11 = arith.constant 0 : index
    %8 = vector.load %arg2[%c72, %c0_11] : memref<216x128xf32, #tpu.memory_space<vmem>>, vector<16x8xf32>
    %c72_12 = arith.constant 72 : index
    %c8 = arith.constant 8 : index
    %9 = vector.load %arg2[%c72_12, %c8] : memref<216x128xf32, #tpu.memory_space<vmem>>, vector<16x1xf32>
    %c88 = arith.constant 88 : index
    %c0_13 = arith.constant 0 : index
    %10 = vector.load %arg2[%c88, %c0_13] : memref<216x128xf32, #tpu.memory_space<vmem>>, vector<128x8xf32>
    %c127_i32 = arith.constant 127 : i32
    %11 = tpu.dynamic_rotate %1 by %c127_i32 dim 1 : vector<32x128xf32>, i32 -> vector<32x128xf32>
    %c126_i32 = arith.constant 126 : i32
    %12 = tpu.dynamic_rotate %1 by %c126_i32 dim 1 : vector<32x128xf32>, i32 -> vector<32x128xf32>
    %13 = tpu.concatenate %1, %11, %12 in 0 : vector<32x128xf32>, vector<32x128xf32>, vector<32x128xf32> -> vector<96x128xf32>
    %cst = arith.constant dense<0.000000e+00> : vector<32x128xf32>
    %14 = tpu.matmul %2, %13, %cst {dimension_numbers = #tpu.dot_dimension_numbers<[1], [0], [0], [1], [0, 0, 1, 1], [], []>} : vector<32x96xf32>, vector<96x128xf32>, vector<32x128xf32> -> vector<32x128xf32>
    %15 = vector.broadcast %3 : vector<32x1xf32> to vector<32x128xf32>
    %16 = arith.addf %14, %15 : vector<32x128xf32>
    %cst_14 = arith.constant 0.000000e+00 : f32
    %17 = vector.broadcast %cst_14 : f32 to vector<32x128xf32>
    %18 = arith.cmpf ogt, %16, %17 : vector<32x128xf32>
    %cst_15 = arith.constant 0.00999999977 : f32
    %19 = vector.broadcast %cst_15 : f32 to vector<32x128xf32>
    %20 = arith.mulf %19, %16 : vector<32x128xf32>
    %21 = arith.select %18, %16, %20 : vector<32x128xi1>, vector<32x128xf32>
    %c127_i32_16 = arith.constant 127 : i32
    %22 = tpu.dynamic_rotate %21 by %c127_i32_16 dim 1 : vector<32x128xf32>, i32 -> vector<32x128xf32>
    %23 = arith.maximumf %21, %22 : vector<32x128xf32>
    %c126_i32_17 = arith.constant 126 : i32
    %24 = tpu.dynamic_rotate %23 by %c126_i32_17 dim 1 : vector<32x128xf32>, i32 -> vector<32x128xf32>
    %c124_i32 = arith.constant 124 : i32
    %25 = tpu.dynamic_rotate %23 by %c124_i32 dim 1 : vector<32x128xf32>, i32 -> vector<32x128xf32>
    %26 = tpu.concatenate %23, %24, %25 in 0 : vector<32x128xf32>, vector<32x128xf32>, vector<32x128xf32> -> vector<96x128xf32>
    %cst_18 = arith.constant dense<0.000000e+00> : vector<32x128xf32>
    %27 = tpu.matmul %4, %26, %cst_18 {dimension_numbers = #tpu.dot_dimension_numbers<[1], [0], [0], [1], [0, 0, 1, 1], [], []>} : vector<32x96xf32>, vector<96x128xf32>, vector<32x128xf32> -> vector<32x128xf32>
    %28 = vector.broadcast %5 : vector<32x1xf32> to vector<32x128xf32>
    %29 = arith.addf %27, %28 : vector<32x128xf32>
    %cst_19 = arith.constant 0.000000e+00 : f32
    %30 = vector.broadcast %cst_19 : f32 to vector<32x128xf32>
    %31 = arith.cmpf ogt, %29, %30 : vector<32x128xf32>
    %cst_20 = arith.constant 0.00999999977 : f32
    %32 = vector.broadcast %cst_20 : f32 to vector<32x128xf32>
    %33 = arith.mulf %32, %29 : vector<32x128xf32>
    %34 = arith.select %31, %29, %33 : vector<32x128xi1>, vector<32x128xf32>
    %cst_21 = arith.constant dense<0.000000e+00> : vector<32x8xf32>
    %35 = tpu.matmul %34, %10, %cst_21 {dimension_numbers = #tpu.dot_dimension_numbers<[1], [0], [0], [1], [0, 0, 1, 1], [], []>} : vector<32x128xf32>, vector<128x8xf32>, vector<32x8xf32> -> vector<32x8xf32>
    %cst_22 = arith.constant dense<0.000000e+00> : vector<8x8xf32>
    %36 = tpu.matmul %6, %35, %cst_22 {dimension_numbers = #tpu.dot_dimension_numbers<[1], [0], [0], [1], [0, 0, 1, 1], [], []>} : vector<8x32xf32>, vector<32x8xf32>, vector<8x8xf32> -> vector<8x8xf32>
    %37 = vector.broadcast %7 : vector<8x1xf32> to vector<8x8xf32>
    %38 = arith.addf %36, %37 : vector<8x8xf32>
    %cst_23 = arith.constant 0.000000e+00 : f32
    %39 = vector.broadcast %cst_23 : f32 to vector<8x8xf32>
    %40 = arith.cmpf ogt, %38, %39 : vector<8x8xf32>
    %cst_24 = arith.constant 0.00999999977 : f32
    %41 = vector.broadcast %cst_24 : f32 to vector<8x8xf32>
    %42 = arith.mulf %41, %38 : vector<8x8xf32>
    %43 = arith.select %40, %38, %42 : vector<8x8xi1>, vector<8x8xf32>
    %cst_25 = arith.constant dense<0.000000e+00> : vector<16x8xf32>
    %44 = tpu.matmul %8, %43, %cst_25 {dimension_numbers = #tpu.dot_dimension_numbers<[1], [0], [0], [1], [0, 0, 1, 1], [], []>} : vector<16x8xf32>, vector<8x8xf32>, vector<16x8xf32> -> vector<16x8xf32>
    %45 = vector.broadcast %9 : vector<16x1xf32> to vector<16x8xf32>
    %46 = arith.addf %44, %45 : vector<16x8xf32>
    %cst_26 = arith.constant 0.000000e+00 : f32
    %47 = vector.broadcast %cst_26 : f32 to vector<16x8xf32>
    %48 = arith.cmpf ogt, %46, %47 : vector<16x8xf32>
    %cst_27 = arith.constant 0.00999999977 : f32
    %49 = vector.broadcast %cst_27 : f32 to vector<16x8xf32>
    %50 = arith.mulf %49, %46 : vector<16x8xf32>
    %51 = arith.select %48, %46, %50 : vector<16x8xi1>, vector<16x8xf32>
    %c0_28 = arith.constant 0 : index
    %c0_29 = arith.constant 0 : index
    %c0_30 = arith.constant 0 : index
    %52 = vector.load %arg3[%c0_28, %c0_29, %c0_30] : memref<1x16x8xf32, #tpu.memory_space<vmem>>, vector<1x16x8xf32>
    %53 = vector.shape_cast %52 : vector<1x16x8xf32> to vector<16x8xf32>
    %54 = vector.shape_cast %51 : vector<16x8xf32> to vector<1x16x8xf32>
    tpu.vector_store %arg3[%c0_28, %c0_29, %c0_30], %54 {strides = array<i32>} : memref<1x16x8xf32, #tpu.memory_space<vmem>>, vector<1x16x8xf32>,
    return
  }
  func.func @transform_0(%arg0: i32) -> (i32, i32, i32) {
    %c0_i32 = arith.constant 0 : i32
    %c0_i32_0 = arith.constant 0 : i32
    %c0_i32_1 = arith.constant 0 : i32
    return %arg0, %c0_i32, %c0_i32_0 : i32, i32, i32
  }
  func.func @transform_1(%arg0: i32) -> (i32, i32) {
    %c0_i32 = arith.constant 0 : i32
    %c0_i32_0 = arith.constant 0 : i32
    %c0_i32_1 = arith.constant 0 : i32
    return %c0_i32, %c0_i32_0 : i32, i32
  }
  func.func @transform_2(%arg0: i32) -> (i32, i32, i32) {
    %c0_i32 = arith.constant 0 : i32
    %c0_i32_0 = arith.constant 0 : i32
    %c0_i32_1 = arith.constant 0 : i32
    return %arg0, %c0_i32, %c0_i32_0 : i32, i32, i32
  }
}

</mosaic_0001>

<bundles_post_ra>
// kernel: tpu_custom_call.1
= control target key start
LH: loop header
LB: loop body
LE: loop exit
PB: predicated region body
PF: predicated region fallthrough
CT: control target
= control target key end

     0   :  { %7 = vsyncpa [#allocation3], 0  ;;  %s1543_s0 = inlined_call_operand.hbm [shape: f32[2,32,128], index: 0, kind: input, shape index: {}]   ;;  %s1544_s1 = inlined_call_operand.hbm [shape: f32[216,128], index: 1, kind: input, shape index: {}]   ;;  %s1545_s2 = inlined_call_operand.vmem [shape: f32[2,16,8], index: 2, kind: output, shape index: {}]  }
   0x1   :  { %9 = vsyncpa [#allocation3 + $0x1], 0 }
   0x2   :  { %10 = vsyncpa [#allocation5], 0  ;;  %s1375_s9 = smov 0   ;;  %s1377_s10 = smov 0  }
   0x3   :  { %s1379_s11 = smov 0   ;;  %s1381_s12 = smov 0  }
   0x4 LB: > { %s1394_s13 = sadd.s32 4294967295, %s1345_s12   ;;  %p36_p0 = scmp.ne.s32.totalorder %s1337_s10, %s1333_s9  ;;  %s1345_s12 = sphi %s1381_s12, %s1560_s12   ;;  %s1341_s11 = sphi %s1379_s11, %s1559_s11   ;;  %s1337_s10 = sphi %s1377_s10, %s1558_s10   ;;  %s1333_s9 = sphi %s1375_s9, %s1557_s9  }
   0x5   : > { %p1546_p1 = scmp.eq.s32.totalorder %s1394_s13, 0  ;;  %p847_p2 = scmp.ge.s32.totalorder %s1345_s12, 1 }
   0x6   : > { %p94_p3 = scmp.lt.s32.totalorder %s1345_s12, 3  ;;  %s1347_s16 = smov [#allocation4]  }
   0x7   : > { %p1402_p4 = por %p1546_p1, %p36_p0  ;;  %s106_s17 = sshll.u32 %s1347_s16, 4  ;;  %s107_s17 = int_to_ptr.vmem [resolvable:$true] %s106_s17 }
   0x8   : > { %p1406_p5 = pnand %p847_p2, %p94_p3  ;;  %s1419_s19 = sadd.s32 1, %s1345_s12  }
   0x9   : > { %s1549_s14 = scalar_select %p1402_p4, 1, 0 }
   0xa   : > { %s1550_s15 = scalar_select %p1406_p5, 1, 0 }
   0xb   : > { %p1139_p6 = pneg %p1406_p5  ;;  %s23_s20 = sadd.s32 1, %s1341_s11 }
   0xc   : > { %s20_s21 = ssub.s32 %s1345_s12, %s1419_s19  ;;  %s1249_s24 = scalar_lea.hbm %s1544_s1, 3456 }
   0xd   : > { %p1414_p7 = pnand %p1139_p6, %p1546_p1  ;;  %p1250_p8 = scmp.ne.s32.totalorder %s1544_s1, %s1249_s24 }
   0xe   : > { %p1256_p12 = scmp.lt.u32.totalorder %s1249_s24, %s1544_s1 }
   0xf   : > { %p1251_p9 = pneg %p1414_p7 }
  0x11   : > { %p1252_p10 = pnand %p1251_p9, %p1250_p8 }
  0x13   : > { %p1253_p11 = pneg %p1252_p10 }
  0x15   : > { %p1258_p13 = pnand %p1256_p12, %p1253_p11 }
  0x17   : > { %1261 = shalt.err (!%p1258_p13)
}
  0x18   : > { %s1262_s29 = scalar_lea.vmem %s107_s17, 3456  ;;  %p1270_p6 = scmp.lt.s32.totalorder %s107_s17, %s107_s17 }
  0x19   : > { %p1263_p0 = scmp.ne.s32.totalorder %s107_s17, %s1262_s29  ;;  %p1271_p1 = scmp.lt.s32.totalorder %s1262_s29, %s1262_s29 }
  0x1b   : > { %p1265_p2 = pnand %p1263_p0, %p1251_p9  ;;  %p1272_p4 = por %p1271_p1, %p1270_p6 }
  0x1d   : > { %p1266_p3 = pneg %p1265_p2 }
  0x1f   : > { %p1273_p5 = pnand %p1272_p4, %p1266_p3 }
  0x21   : > { %1276 = shalt.err (!%p1273_p5)
}
  0x22   : > { %s1348_s30 = smov 128   ;;  %s1349_s3 = smov 8  }
  0x23   : > { %1142 = dma.hbm_to_vmem [thread:$0]  (!%p1414_p7), %s1544_s1, 3456, %s107_s17, [#allocation5], %s1348_s30, %s1348_s30, %s1349_s3  }
  0x24   : > { %p21_p1 = scmp.eq.s32.totalorder %s20_s21, 0  ;;  %p30_p4 = scmp.ne.s32.totalorder %s1341_s11, %s1337_s10 }
  0x25   : > { %p31_p5 = scmp.eq.s32.totalorder %s1345_s12, 0  ;;  %p1148_p8 = scmp.lt.s32.totalorder %s1345_s12, 2 }
  0x26   : > { %s1448_s6 = scalar_select %p21_p1, %s1341_s11, %s23_s20  }
  0x27   : > { %p32_p9 = por %p31_p5, %p30_p4  ;;  %s120_s7 = sand.u32 1, %s1341_s11  }
  0x28   : > { %s850_s8 = sshll.u32 %s120_s7, 5  ;;  %s871_s9 = sshll.u32 %s1345_s12, 9 }
  0x29   : > { %s1455_s18 = scalar_lea.hbm %s1543_s0, %s871_s9  ;;  %s124_s17 = scalar_lea.vmem [#allocation2], %s850_s8 }
  0x2a   : > { %s131_s21 = sshll.u32 %s124_s17, 4  ;;  %p1459_p7 = pnand %p1148_p8, %p32_p9  ;;  %s1457_s21 = int_to_ptr.vmem [resolvable:$true] %s131_s21 }
  0x2b   : > { %s1463_s12 = scalar_lea.sflag [#allocation3], %s120_s7  ;;  %s1277_s23 = scalar_lea.hbm %s1455_s18, 512 }
  0x2c   : > { %p1278_p10 = scmp.ne.s32.totalorder %s1455_s18, %s1277_s23  ;;  %p1279_p11 = pneg %p1459_p7 }
  0x2d   : > { %s1282_s26 = scalar_lea.hbm %s1543_s0, 1024  ;;  %p1283_p0 = scmp.lt.u32.totalorder %s1455_s18, %s1543_s0 }
  0x2e   : > { %p1280_p12 = pnand %p1279_p11, %p1278_p10  ;;  %p1284_p2 = scmp.lt.u32.totalorder %s1282_s26, %s1277_s23 }
  0x2f   : > { %p1286_p6 = scmp.lt.u32.totalorder %s1277_s23, %s1455_s18 }
  0x30   : > { %p1281_p13 = pneg %p1280_p12  ;;  %p1285_p3 = por %p1284_p2, %p1283_p0 }
  0x32   : > { %p1287_p1 = por %p1286_p6, %p1285_p3 }
  0x34   : > { %p1288_p4 = pnand %p1287_p1, %p1281_p13 }
  0x36   : > { %1291 = shalt.err (!%p1288_p4)
}
  0x37   : > { %s1292_s29 = scalar_lea.vmem %s1457_s21, 512  ;;  %s1350_s4 = smov [#allocation2]  }
  0x38   : > { %p1293_p5 = scmp.ne.s32.totalorder %s1457_s21, %s1292_s29  ;;  %s1297_s5 = sshll.u32 %s1350_s4, 4  ;;  %s1298_s5 = int_to_ptr.vmem [resolvable:$false] %s1297_s5 }
  0x39   : > { %s1299_s7 = scalar_lea.vmem %s1298_s5, 1024  ;;  %p1300_p10 = scmp.lt.s32.totalorder %s1457_s21, %s1298_s5 }
  0x3a   : > { %p1295_p8 = pnand %p1293_p5, %p1279_p11  ;;  %p1301_p12 = scmp.lt.s32.totalorder %s1299_s7, %s1292_s29 }
  0x3c   : > { %p1296_p9 = pneg %p1295_p8  ;;  %p1302_p0 = por %p1301_p12, %p1300_p10 }
  0x3e   : > { %p1303_p2 = pnand %p1302_p0, %p1296_p9 }
  0x40   : > { %1306 = shalt.err (!%p1303_p2)
}
  0x41   : > { %1146 = dma.hbm_to_vmem [thread:$0]  (!%p1459_p7), %s1455_s18, 512, %s1457_s21, %s1463_s12, %s1348_s30, %s1348_s30, %s1349_s3  }
  0x42   : > { %p1553_p11 = scmp.ne.s32.totalorder %s1550_s15, 0 }
  0x43   : > { %s145_s8 = sand.u32 (!%p1553_p11), 1, %s1337_s10   ;;  %p1554_p13 = scmp.ne.s32.totalorder (!%p1553_p11), %s1549_s14, 0 }
  0x44   : > { %143 = sbr.rel (%p1553_p11) target bundleno = 1572 (0x624), region = 28  ;;  %s854_s9 = sshll.u32 (!%p1553_p11), %s145_s8, 5 }
  0x45   : > { %s146_s16 = scalar_lea.sflag (!%p1553_p11), [#allocation3], %s145_s8  ;;  %s149_s22 = scalar_lea.vmem (!%p1553_p11), [#allocation2], %s854_s9 }
  0x4b   : > { %1324 = dma.done.wait (%p1554_p13), %s146_s16, 512  }
  0x4c   : > { %1326 = vsyncadd (%p1554_p13), %s146_s16, 4294966784  ;;  %p1555_p3 = scmp.eq.s32.totalorder %s1394_s13, 0 }
  0x4e   : > { %1328 = dma.done.wait (%p1555_p3), [#allocation5], 3456   ;;  %p1556_p6 = pmov %p1555_p3 }
  0x4f   : > { %v179_v0 = vld [vmem:[%s149_s22] sm:$0xff]  ;;  %v180_v1 = vld [vmem:[%s149_s22 + $0x8] sm:$0xff]  ;;  %v181_v2 = vld [vmem:[%s149_s22 + $0x10] sm:$0xff]  ;;  %s1351_s15 = smov 127   ;;  %s1352_s30 = smov 126   ;;  %vm246_vm0 = vcmask 785408  }
  0x50   : > { %1330 = vsyncadd (%p1556_p6), [#allocation5], 4294963840  ;;  %v1194_v3 = vpack.i.bf16 %v180_v1, %v179_v0  ;;  %v182_v4 = vld [vmem:[%s149_s22 + $0x18] sm:$0xff]  ;;  %v1047_v5 = vpack.c.bf16 %v180_v1, %v179_v0  ;;  %v183_v8 = vld [vmem:[#allocation4] sm:$0xff]  ;;  %v1353_v10 = vmov 96   ;;  %s1354_s14 = smov 124  }
  0x51   : > { %v1051_v6 = vpack.c.bf16 %v182_v4, %v181_v2  ;;  %v1199_v7 = vpack.i.bf16 %v182_v4, %v181_v2  ;;  %957 = vmatprep.mubr.msk.f32.mxu0 %vm246_vm0, %v183_v8  ;;  %v184_v9 = vld [vmem:[#allocation4 + $0x8] sm:$0xff]  ;;  %1215 = vset.pattern.permute.xlu1 %v1353_v10  ;;  %v185_v11 = vld [vmem:[#allocation4 + $0x10] sm:$0xff]  ;;  %v186_v12 = vld [vmem:[#allocation4 + $0x18] sm:$0xff]  ;;  %vm1356_vm9 = vmmov 0   ;;  %vm595_vm10 = vcmask 261120   ;;  %p174_p7 = scmp.lt.s32.totalorder %s1394_s13, 1 }
  0x52   : > { %1195 = vrot.lane.b32.xlu0 %v1194_v3, %s1351_s15  ;;  %1205 = vrot.lane.b32.xlu1 %v1194_v3, %s1352_s30  ;;  %v187_v50 = vld [vmem:[#allocation4 + $0x20] sm:$0xff]  ;;  %v188_v2 = vld [vmem:[#allocation4 + $0x28] sm:$0xff]  ;;  %v189_v3 = vld [vmem:[#allocation4 + $0x30] sm:$0xff]  ;;  %vm681_vm11 = vcmask 64512  }
  0x53   : > { %1048 = vmatprep.subr.bf16.mxu0 %v1047_v5  ;;  %1214 = vset.pattern.permute.xlu0 %v1353_v10  ;;  %v190_v4 = vld [vmem:[#allocation4 + $0x38] sm:$0xff]  ;;  %s1562_s13 = smov (!%p174_p7, %s1394_s13), 1 }
  0x54   : > { %1050 = vmatpush3.bf16.msra.mxu0 %v1047_v5  ;;  %987 = vmatprep.mubr.msk.f32.mxu1 %vm246_vm0, %v187_v50  ;;  %v194_v5 = vld [vmem:[#allocation4 + $0x58] sm:$0xff]  ;;  %s872_s3 = sshll.u32 %s1562_s13, 4 }
  0x55   : > { %1052 = vmatprep.subr.bf16.mxu0 %v1051_v6  ;;  %s178_s21 = scalar_lea.vmem %s1545_s2, %s872_s3 }
  0x56   : > { %1200 = vrot.lane.b32.xlu0 %v1199_v7, %s1351_s15  ;;  %1210 = vrot.lane.b32.xlu1 %v1199_v7, %s1352_s30  ;;  %v196_v7 = vld [vmem:[#allocation4 + $0x68] sm:$0xff] }
  0x58   : > { %1054 = vmatpush3.bf16.msra.mxu0 %v1051_v6  ;;  %v195_v6 = vld [vmem:[#allocation4 + $0x60] sm:$0xff] }
  0x5a   : > { %233 = vperm.xlu1 %1215, %v184_v9   ;;  %228 = vperm.xlu0 %1214, %v183_v8   ;;  %v1095_v8 = vpack.c.bf16 %v195_v6, %v194_v5 }
  0x5e   : > { %238 = vperm.xlu1 %1215, %v185_v11   ;;  %243 = vperm.xlu0 %1214, %v186_v12  }
  0xc4   : > { %v1196_v13 = vpop.permute.xlu0 %1195  ;;  %v1206_v14 = vpop.permute.xlu1 %1205 }
  0xc5   : > { %v1198_v15 = vunpack.i.h.bf16 %v1196_v13  ;;  %v1197_v16 = vunpack.i.l.bf16 %v1196_v13  ;;  %v1208_v18 = vunpack.i.h.bf16 %v1206_v14  ;;  %v1207_v19 = vunpack.i.l.bf16 %v1206_v14  ;;  %v200_v14 = vld [vmem:[#allocation4 + $0x88] sm:$0xff] }
  0xc7   : > { %v1055_v17 = vpack.c.bf16 %v1198_v15, %v1197_v16  ;;  %v1063_v25 = vpack.c.bf16 %v1208_v18, %v1207_v19  ;;  %v201_v15 = vld [vmem:[#allocation4 + $0x90] sm:$0xff]  ;;  %v203_v18 = vld [vmem:[#allocation4 + $0xa0] sm:$0xff] }
  0xc8   : > { %v1201_v20 = vpop.permute.xlu0 %1200  ;;  %v1211_v21 = vpop.permute.xlu1 %1210  ;;  %v1107_v16 = vpack.c.bf16 %v201_v15, %v200_v14 }
  0xc9   : > { %v1203_v22 = vunpack.i.h.bf16 %v1201_v20  ;;  %v1202_v23 = vunpack.i.l.bf16 %v1201_v20  ;;  %1056 = vmatprep.subr.bf16.mxu0 %v1055_v17  ;;  %v1213_v26 = vunpack.i.h.bf16 %v1211_v21  ;;  %v1212_v27 = vunpack.i.l.bf16 %v1211_v21  ;;  %v204_v20 = vld [vmem:[#allocation4 + $0xa8] sm:$0xff]  ;;  %v205_v21 = vld [vmem:[#allocation4 + $0xb0] sm:$0xff] }
  0xca   : > { %1058 = vmatpush3.bf16.msra.mxu0 %v1055_v17  ;;  %v202_v17 = vld [vmem:[#allocation4 + $0x98] sm:$0xff] }
  0xcb   : > { %v1059_v24 = vpack.c.bf16 %v1203_v22, %v1202_v23  ;;  %v1067_v28 = vpack.c.bf16 %v1213_v26, %v1212_v27  ;;  %v1111_v19 = vpack.c.bf16 %v203_v18, %v202_v17  ;;  %v1115_v22 = vpack.c.bf16 %v205_v21, %v204_v20 }
  0xcd   : > { %1060 = vmatprep.subr.bf16.mxu0 %v1059_v24 }
  0xce   : > { %1062 = vmatpush3.bf16.msra.mxu0 %v1059_v24 }
  0xcf   : > { %1064 = vmatprep.subr.bf16.mxu0 %v1063_v25 }
  0xd2   : > { %1066 = vmatpush3.bf16.msra.mxu0 %v1063_v25 }
  0xd3   : > { %1068 = vmatprep.subr.bf16.mxu0 %v1067_v28 }
  0xd6   : > { %1070 = vmatpush3.bf16.msra.mxu0 %v1067_v28 }
  0xd7   : > { %1096 = vmatprep.subr.bf16.mxu0 %v1095_v8 }
  0xd9   : > { %958 = vmatmul.mubr.msk.f32.vlgmr.msra.gmra.mrb[0].mxu0 %vm246_vm0, %v184_v9  ;;  %v229_v29 = vpop.permute.xlu0 %228  ;;  %v234_v30 = vpop.permute.xlu1 %233  ;;  %v197_v9 = vld [vmem:[#allocation4 + $0x70] sm:$0xff] }
  0xda   : > { %960 = vmatprep.mubr.msk.f32.mxu0 %vm246_vm0, %v185_v11  ;;  %v1099_v10 = vpack.c.bf16 %v197_v9, %v196_v7  ;;  %v198_v11 = vld [vmem:[#allocation4 + $0x78] sm:$0xff]  ;;  %1098 = vmatpush3.bf16.msra.mxu0 %v1095_v8 }
  0xdc   : > { %1100 = vmatprep.subr.bf16.mxu0 %v1099_v10 }
  0xdd   : > { %961 = vmatmul.mubr.msk.f32.gmra.mrb[2].mxu0 %vm246_vm0, %v186_v12  ;;  %v244_v36 = vpop.permute.xlu0 %243  ;;  %v239_v39 = vpop.permute.xlu1 %238  ;;  %v199_v12 = vld [vmem:[#allocation4 + $0x80] sm:$0xff] }
  0xde   : > { %v1103_v13 = vpack.c.bf16 %v199_v12, %v198_v11  ;;  %1102 = vmatpush3.bf16.msra.mxu0 %v1099_v10  ;;  %v192_v11 = vld [vmem:[#allocation4 + $0x48] sm:$0xff]  ;;  %v193_v12 = vld [vmem:[#allocation4 + $0x50] sm:$0xff] }
  0xe0   : > { %1104 = vmatprep.subr.bf16.mxu0 %v1103_v13 }
  0xe2   : > { %1106 = vmatpush3.bf16.msra.mxu0 %v1103_v13  ;;  %v1359_v13 = vmov 8  }
  0xe3   : > { %1108 = vmatprep.subr.bf16.mxu0 %v1107_v16 }
  0xe6   : > { %1110 = vmatpush3.bf16.msra.mxu0 %v1107_v16 }
  0xe7   : > { %1112 = vmatprep.subr.bf16.mxu0 %v1111_v19 }
  0xea   : > { %1114 = vmatpush3.bf16.msra.mxu0 %v1111_v19 }
  0xeb   : > { %1116 = vmatprep.subr.bf16.mxu0 %v1115_v22 }
  0xee   : > { %1118 = vmatpush3.bf16.msra.mxu0 %v1115_v22 }
 0x1ac   : > { %v959_v31 = vpop.f32.mrb[0].mxu0 }
 0x1ad   : > { %v327_v32 = vadd.f32 %v959_v31, %v234_v30  ;;  %v321_v33 = vpop.f32.mrb[1].mxu0 }
 0x1ae   : > { %v322_v34 = vadd.f32 %v321_v33, %v229_v29 }
 0x1af   : > { %vm341_vm1 = vcmp.gt.f32.partialorder %v327_v32, 0.0  ;;  %v345_v35 = vmul.f32 0.01, %v327_v32 }
 0x1b0   : > { %vm340_vm2 = vcmp.gt.f32.partialorder %v322_v34, 0.0  ;;  %v344_v37 = vmul.f32 0.01, %v322_v34  ;;  %v962_v38 = vpop.f32.mrb[2].mxu0 }
 0x1b1   : > { %v337_v40 = vadd.f32 %v962_v38, %v244_v36  ;;  %v331_v41 = vpop.f32.mrb[3].mxu0  ;;  %v349_v42 = vsel %vm341_vm1, %v327_v32, %v345_v35 }
 0x1b2   : > { %v332_v43 = vadd.f32 %v331_v41, %v239_v39  ;;  %v348_v44 = vsel %vm340_vm2, %v322_v34, %v344_v37  ;;  %v206_v39 = vld [vmem:[#allocation4 + $0xb8] sm:$0xff] }
 0x1b3   : > { %vm343_vm3 = vcmp.gt.f32.partialorder %v337_v40, 0.0  ;;  %v347_v45 = vmul.f32 0.01, %v337_v40  ;;  %v1216_v46 = vpack.i.bf16 %v349_v42, %v348_v44 }
 0x1b4   : > { %vm342_vm4 = vcmp.gt.f32.partialorder %v332_v43, 0.0  ;;  %v346_v47 = vmul.f32 0.01, %v332_v43 }
 0x1b5   : > { %1217 = vrot.lane.b32.xlu1 %v1216_v46, %s1351_s15  ;;  %v351_v48 = vsel %vm343_vm3, %v337_v40, %v347_v45  ;;  %v207_v40 = vld [vmem:[#allocation4 + $0xc0] sm:$0xff] }
 0x1b6   : > { %v350_v49 = vsel %vm342_vm4, %v332_v43, %v346_v47  ;;  %v1119_v41 = vpack.c.bf16 %v207_v40, %v206_v39  ;;  %v209_v43 = vld [vmem:[#allocation4 + $0xd0] sm:$0xff] }
 0x1b7   : > { %v1221_v51 = vpack.i.bf16 %v351_v48, %v350_v49 }
 0x1b8   : > { %1120 = vmatprep.subr.bf16.mxu0 %v1119_v41 }
 0x1b9   : > { %1222 = vrot.lane.b32.xlu0 %v1221_v51, %s1351_s15  ;;  %1122 = vmatpush3.bf16.msra.mxu0 %v1119_v41 }
 0x227   : > { %v1218_v52 = vpop.permute.xlu1 %1217 }
 0x228   : > { %v1220_v53 = vunpack.i.h.bf16 %v1218_v52  ;;  %v1219_v54 = vunpack.i.l.bf16 %v1218_v52 }
 0x22a   : > { %v361_v55 = vmax.f32 %v349_v42, %v1220_v53  ;;  %v360_v56 = vmax.f32 %v348_v44, %v1219_v54  ;;  %v208_v42 = vld [vmem:[#allocation4 + $0xc8] sm:$0xff] }
 0x22b   : > { %v1223_v57 = vpop.permute.xlu0 %1222  ;;  %v1123_v44 = vpack.c.bf16 %v209_v43, %v208_v42 }
 0x22c   : > { %v1225_v58 = vunpack.i.h.bf16 %v1223_v57  ;;  %v1224_v59 = vunpack.i.l.bf16 %v1223_v57  ;;  %v1226_v60 = vpack.i.bf16 %v361_v55, %v360_v56  ;;  %v1071_v61 = vpack.c.bf16 %v361_v55, %v360_v56 }
 0x22d   : > { %1124 = vmatprep.subr.bf16.mxu0 %v1123_v44 }
 0x22e   : > { %v363_v62 = vmax.f32 %v351_v48, %v1225_v58  ;;  %v362_v63 = vmax.f32 %v350_v49, %v1224_v59  ;;  %1227 = vrot.lane.b32.xlu1 %v1226_v60, %s1352_s30  ;;  %1072 = vmatprep.subr.bf16.mxu1 %v1071_v61 }
 0x22f   : > { %1074 = vmatpush3.bf16.msra.mxu1 %v1071_v61  ;;  %1126 = vmatpush3.bf16.msra.mxu0 %v1123_v44 }
 0x230   : > { %v1231_v0 = vpack.i.bf16 %v363_v62, %v362_v63  ;;  %v1075_v1 = vpack.c.bf16 %v363_v62, %v362_v63 }
 0x232   : > { %1232 = vrot.lane.b32.xlu0 %v1231_v0, %s1352_s30  ;;  %1237 = vrot.lane.b32.xlu1 %v1226_v60, %s1354_s14 }
 0x233   : > { %1076 = vmatprep.subr.bf16.mxu1 %v1075_v1 }
 0x234   : > { %1078 = vmatpush3.bf16.msra.mxu1 %v1075_v1  ;;  %v1355_v1 = vmov 0.0|0.0  }
 0x236   : > { %1242 = vrot.lane.b32.xlu0 %v1231_v0, %s1354_s14  ;;  %382 = vperm.xlu1 %1215, %v187_v50  }
 0x23a   : > { %387 = vperm.xlu0 %1214, %v188_v2   ;;  %392 = vperm.xlu1 %1215, %v189_v3  }
 0x23e   : > { %397 = vperm.xlu0 %1214, %v190_v4  }
 0x242   : > { %1247 = vset.pattern.permute.xlu0 %v1359_v13 }
 0x243   : > { %673 = vperm.xlu0 %1247, %v192_v11  }
 0x2a0   : > { %v1228_v23 = vpop.permute.xlu1 %1227 }
 0x2a1   : > { %v1230_v24 = vunpack.i.h.bf16 %v1228_v23  ;;  %v1229_v25 = vunpack.i.l.bf16 %v1228_v23 }
 0x2a3   : > { %v1079_v26 = vpack.c.bf16 %v1230_v24, %v1229_v25 }
 0x2a4   : > { %v1233_v27 = vpop.permute.xlu0 %1232  ;;  %v1238_v28 = vpop.permute.xlu1 %1237 }
 0x2a5   : > { %v1235_v29 = vunpack.i.h.bf16 %v1233_v27  ;;  %v1234_v30 = vunpack.i.l.bf16 %v1233_v27  ;;  %v1240_v31 = vunpack.i.h.bf16 %v1238_v28  ;;  %v1239_v32 = vunpack.i.l.bf16 %v1238_v28  ;;  %1080 = vmatprep.subr.bf16.mxu1 %v1079_v26 }
 0x2a6   : > { %1082 = vmatpush3.bf16.msra.mxu1 %v1079_v26 }
 0x2a7   : > { %v1083_v33 = vpack.c.bf16 %v1235_v29, %v1234_v30  ;;  %v1087_v35 = vpack.c.bf16 %v1240_v31, %v1239_v32 }
 0x2a8   : > { %v1243_v34 = vpop.permute.xlu0 %1242 }
 0x2a9   : > { %v1245_v36 = vunpack.i.h.bf16 %v1243_v34  ;;  %v1244_v37 = vunpack.i.l.bf16 %v1243_v34  ;;  %1084 = vmatprep.subr.bf16.mxu1 %v1083_v33 }
 0x2aa   : > { %1086 = vmatpush3.bf16.msra.mxu1 %v1083_v33 }
 0x2ab   : > { %1088 = vmatprep.subr.bf16.mxu1 %v1087_v35  ;;  %v1091_v38 = vpack.c.bf16 %v1245_v36, %v1244_v37 }
 0x2ae   : > { %1090 = vmatpush3.bf16.msra.mxu1 %v1087_v35 }
 0x2af   : > { %1092 = vmatprep.subr.bf16.mxu1 %v1091_v38 }
 0x2b2   : > { %1094 = vmatpush3.bf16.msra.mxu1 %v1091_v38 }
 0x2b3   : > { %1127 = vmatprep.subr.bf16.mxu1 %v1355_v1 }
 0x2b5   : > { %988 = vmatmul.mubr.msk.f32.vlgmr.msra.gmra.mrb[0].mxu1 %vm246_vm0, %v188_v2  ;;  %v383_v46 = vpop.permute.xlu1 %382  ;;  %v1357_v2 = vmov 0.0  }
 0x2b6   : > { %990 = vmatprep.mubr.msk.f32.mxu1 %vm246_vm0, %v189_v3  ;;  %v191_v3 = vld [vmem:[#allocation4 + $0x40] sm:$0xff] }
 0x2b9   : > { %991 = vmatmul.mubr.msk.f32.gmra.mrb[2].mxu1 %vm246_vm0, %v190_v4  ;;  %v388_v45 = vpop.permute.xlu0 %387  ;;  %v393_v55 = vpop.permute.xlu1 %392  ;;  %v1358_v4 = vmov 32  }
 0x2ba   : > { %1039 = vmatprep.mubr.msk.f32.mxu1 %vm1356_vm9, %v1357_v2  ;;  %1246 = vset.pattern.permute.xlu1 %v1358_v4 }
 0x2bb   : > { %592 = vperm.xlu1 %1246, %v191_v3  }
 0x2bd   : > { %v398_v52 = vpop.permute.xlu0 %397 }
 0x2bf   : > { %1248 = vset.pattern.permute.xlu1 %v1359_v13 }
 0x2c0   : > { %678 = vperm.xlu1 %1248, %v193_v12  }
 0x2c2   : > { %v674_v21 = vpop.permute.xlu0 %673 }
 0x33a   : > { %v593_v14 = vpop.permute.xlu1 %592 }
 0x33f   : > { %v679_v20 = vpop.permute.xlu1 %678 }
 0x388   : > { %v989_v47 = vpop.f32.mrb[0].mxu1 }
 0x389   : > { %v480_v48 = vadd.f32 %v989_v47, %v388_v45  ;;  %v474_v49 = vpop.f32.mrb[1].mxu1 }
 0x38a   : > { %v475_v50 = vadd.f32 %v474_v49, %v383_v46 }
 0x38b   : > { %v498_v51 = vmul.f32 0.01, %v480_v48  ;;  %vm494_vm5 = vcmp.gt.f32.partialorder %v480_v48, 0.0 }
 0x38c   : > { %v497_v53 = vmul.f32 0.01, %v475_v50  ;;  %v992_v54 = vpop.f32.mrb[2].mxu1  ;;  %vm493_vm6 = vcmp.gt.f32.partialorder %v475_v50, 0.0 }
 0x38d   : > { %v490_v56 = vadd.f32 %v992_v54, %v398_v52  ;;  %v484_v57 = vpop.f32.mrb[3].mxu1  ;;  %v502_v60 = vsel %vm494_vm5, %v480_v48, %v498_v51 }
 0x38e   : > { %v485_v58 = vadd.f32 %v484_v57, %v393_v55  ;;  %v501_v59 = vsel %vm493_vm6, %v475_v50, %v497_v53 }
 0x38f   : > { %v500_v61 = vmul.f32 0.01, %v490_v56  ;;  %1025 = vmatprep.mubr.f32.mxu0 %v501_v59  ;;  %vm496_vm8 = vcmp.gt.f32.partialorder %v490_v56, 0.0 }
 0x390   : > { %v499_v62 = vmul.f32 0.01, %v485_v58  ;;  %1026 = vmatmul.mubr.f32.vlgmr.msra.gmra.mrb[4].mxu0 %v502_v60  ;;  %vm495_vm7 = vcmp.gt.f32.partialorder %v485_v58, 0.0 }
 0x391   : > { %v504_v0 = vsel %vm496_vm8, %v490_v56, %v500_v61 }
 0x392   : > { %v503_v63 = vsel %vm495_vm7, %v485_v58, %v499_v62 }
 0x393   : > { %1028 = vmatprep.mubr.f32.mxu0 %v503_v63 }
 0x394   : > { %1029 = vmatmul.mubr.f32.gmra.mrb[6].mxu0 %v504_v0 }
 0x463   : > { %v1027_v5 = vpop.f32.mrb[4].mxu0 }
 0x464   : > { %v571_v6 = vpop.f32.mrb[5].mxu0 }
 0x465   : > { %v1128_v7 = vpack.c.bf16 %v1027_v5, %v571_v6 }
 0x467   : > { %v1030_v8 = vpop.f32.mrb[6].mxu0  ;;  %1129 = vmatpush3.bf16.msra.mxu1 %v1128_v7 }
 0x468   : > { %v581_v9 = vpop.f32.mrb[7].mxu0  ;;  %1130 = vmatprep.subr.bf16.mxu1 %v1355_v1 }
 0x469   : > { %v1131_v10 = vpack.c.bf16 %v1030_v8, %v581_v9 }
 0x46b   : > { %1132 = vmatpush3.bf16.msra.mxu1 %v1131_v10 }
 0x46e   : > { %1040 = vmatmul.mubr.msk.f32.vlgmr.msra.gmra.mrb[4].mxu1 %vm595_vm10, %v191_v3 }
 0x46f   : > { %1044 = vmatprep.mubr.msk.f32.mxu1 %vm681_vm11, %v192_v11 }
 0x541   : > { %v664_v15 = vpop.f32.mrb[4].mxu1 }
 0x542   : > { %v665_v16 = vadd.f32 %v664_v15, %v593_v14  ;;  %v1041_v17 = vpop.f32.mrb[5].mxu1 }
 0x544   : > { %v669_v18 = vmul.f32 0.01, %v665_v16  ;;  %vm668_vm12 = vcmp.gt.f32.partialorder %v665_v16, 0.0 }
 0x546   : > { %v670_v19 = vsel %vm668_vm12, %v665_v16, %v669_v18 }
 0x547   : > { %1042 = vmatprep.subr.mxu1 %v670_v19 }
 0x548   : > { %1043 = vmatpush3.msra.mxu1 %v670_v19 }
 0x549   : > { %1045 = vmatmul.mubr.msk.f32.vlgmr.msra.gmra.mrb[6].mxu1 %vm681_vm11, %v193_v12 }
 0x61c   : > { %v1046_v22 = vpop.f32.mrb[6].mxu1 }
 0x61d   : > { %v758_v23 = vadd.f32 %v1046_v22, %v679_v20  ;;  %v752_v24 = vpop.f32.mrb[7].mxu1 }
 0x61e   : > { %v753_v25 = vadd.f32 %v752_v24, %v674_v21 }
 0x61f   : > { %vm762_vm13 = vcmp.gt.f32.partialorder %v758_v23, 0.0  ;;  %v764_v26 = vmul.f32 0.01, %v758_v23 }
 0x620   : > { %vm761_vm14 = vcmp.gt.f32.partialorder %v753_v25, 0.0  ;;  %v763_v27 = vmul.f32 0.01, %v753_v25 }
 0x621   : > { %v766_v28 = vsel %vm762_vm13, %v758_v23, %v764_v26 }
 0x622   : > { %768 = vst.msk [vmem:[%s178_s21 + $0x8] sm:$0xff] %vm681_vm11, %v766_v28  ;;  %v765_v29 = vsel %vm761_vm14, %v753_v25, %v763_v27 }
 0x623   : > { %767 = vst.msk [vmem:[%s178_s21] sm:$0xff] %vm681_vm11, %v765_v29 }
 0x624 PF: > { %p13_p1 = scmp.ge.s32.totalorder %s1419_s19, 4   ;;  %s1557_s9 = smov %s1337_s10 }
 0x625   : > { %s1558_s10 = smov %s1341_s11  ;;  %s1559_s11 = smov %s1448_s6 }
 0x626   : > { %s1560_s12 = smov %s1419_s19  ;;  %15 = sbr.rel (!%p13_p1) target bundleno = 4 (0x4), region = 72 }
 0x62d   :  { %790 = vsyncpa [#allocation3], 1 }
 0x62e   :  { %792 = vsyncpa [#allocation3 + $0x1], 1 }
 0x62f   :  { %793 = vsyncpa [#allocation5], 1 }

</bundles_post_ra>
